<compile_context>
chip_gen: v7x
topology: tpu7x:2x2x1
jax: 0.10.0
libtpu: 0.0.40
codegen_flags: <defaults>
</compile_context>

<pallas_src>
import functools

import jax
import jax.numpy as jnp
from jax.experimental import pallas as pl
from jax.experimental.pallas import tpu as pltpu

LN_EPS = 1e-5
LEAKY_SLOPE = 0.1   # matches nn.LeakyReLU(0.1) in the original module
LANE = 128


def _round_up(x, m):
    return (x + m - 1) // m * m


def _layernorm(h, gamma, beta, inv_count):
    # Single-pass statistics. Padded lanes of h are exactly zero and gamma/beta
    # are zero-padded, so padded lanes drop out of mean/var and of the output.
    mu = jnp.sum(h, axis=-1, keepdims=True) * inv_count
    ms = jnp.sum(h * h, axis=-1, keepdims=True) * inv_count
    var = jnp.maximum(ms - mu * mu, 0.0)
    return (h - mu) * jax.lax.rsqrt(var + LN_EPS) * gamma + beta


def _leaky_relu(h):
    return jnp.where(h > 0, h, LEAKY_SLOPE * h)


def projector_kernel(x_ref, w1_ref, g1_ref, b1_ref,
                     w2_ref, g2_ref, b2_ref, wcat_ref, o_ref, *, inv_hid):
    x = x_ref[...]                                           # bf16 [tile, cin_p]

    # ln1: Linear -> LayerNorm -> LeakyReLU  (bf16 MXU operands, f32 accumulation)
    h = jnp.dot(x, w1_ref[...], preferred_element_type=jnp.float32)
    h = _leaky_relu(_layernorm(h, g1_ref[...], b1_ref[...], inv_hid))

    # ln2: Linear -> LayerNorm -> LeakyReLU
    h = jnp.dot(h.astype(jnp.bfloat16), w2_ref[...],
                preferred_element_type=jnp.float32)
    h = _leaky_relu(_layernorm(h, g2_ref[...], b2_ref[...], inv_hid))

    # ln3 + ffn fused into a single MXU pass: [h, x] @ [[W3], [Wf]]
    hx = jnp.concatenate([h.astype(jnp.bfloat16), x], axis=-1)
    out = jnp.dot(hx, wcat_ref[...], preferred_element_type=jnp.float32)

    o_ref[...] = out.astype(o_ref.dtype)


def projector_pallas(x2d, params, *, tile_n=256):
    """x2d: [N, in_channels] float32. Returns [N, out_channels] float32."""
    n, cin = x2d.shape
    w1, g1, b1, w2, g2, b2, w3, wf = params
    hid = w1.shape[1]
    cout = w3.shape[1]

    # lane-dense (128-multiple) channel dims
    cin_p = _round_up(cin, LANE)
    hid_p = _round_up(hid, LANE)
    cout_p = _round_up(cout, LANE)

    # row tile: big (256) for real workloads, clamped for tiny inputs;
    # multiple of 16 so bf16 x-tiles are sublane-aligned.
    tile = min(tile_n, _round_up(n, 16))
    n_p = _round_up(n, tile)

    bf = jnp.bfloat16

    def pad2(a, rows, cols, dtype):
        return jnp.pad(a, ((0, rows - a.shape[0]),
                           (0, cols - a.shape[1]))).astype(dtype)

    x_p = pad2(x2d, n_p, cin_p, bf)
    w1_p = pad2(w1, cin_p, hid_p, bf)
    w2_p = pad2(w2, hid_p, hid_p, bf)
    wcat = jnp.concatenate([pad2(w3, hid_p, cout_p, bf),
                            pad2(wf, cin_p, cout_p, bf)], axis=0)
    g1_p = pad2(g1, 1, hid_p, jnp.float32)
    b1_p = pad2(b1, 1, hid_p, jnp.float32)
    g2_p = pad2(g2, 1, hid_p, jnp.float32)
    b2_p = pad2(b2, 1, hid_p, jnp.float32)

    grid = (n_p // tile,)
    full = lambda i: (0, 0)

    # Explicit VMEM budget: 2x (double-buffered) blocks + LN/concat temporaries,
    # 1.5x margin, capped at 64 MiB (v7x physical VMEM).
    w_bytes = (cin_p * hid_p + hid_p * hid_p + (hid_p + cin_p) * cout_p) * 2
    gb_bytes = 4 * hid_p * 4
    io_bytes = tile * cin_p * 2 + tile * cout_p * 4
    scratch_bytes = tile * (hid_p + cin_p) * 4 * 4
    need = 2 * (w_bytes + gb_bytes + io_bytes) + scratch_bytes
    vmem_limit = int(min(max(need * 3 // 2, 32 * 2 ** 20), 64 * 2 ** 20))

    out_p = pl.pallas_call(
        functools.partial(projector_kernel, inv_hid=1.0 / float(hid)),
        out_shape=jax.ShapeDtypeStruct((n_p, cout_p), jnp.float32),
        grid_spec=pltpu.PrefetchScalarGridSpec(
            num_scalar_prefetch=0,
            grid=grid,
            in_specs=[
                pl.BlockSpec((tile, cin_p), lambda i: (i, 0)),   # x rows (bf16)
                pl.BlockSpec((cin_p, hid_p), full),              # W1 (bf16)
                pl.BlockSpec((1, hid_p), full),                  # gamma1
                pl.BlockSpec((1, hid_p), full),                  # beta1
                pl.BlockSpec((hid_p, hid_p), full),              # W2 (bf16)
                pl.BlockSpec((1, hid_p), full),                  # gamma2
                pl.BlockSpec((1, hid_p), full),                  # beta2
                pl.BlockSpec((hid_p + cin_p, cout_p), full),     # [W3; Wf] (bf16)
            ],
            out_specs=pl.BlockSpec((tile, cout_p), lambda i: (i, 0)),
        ),
        compiler_params=pltpu.CompilerParams(
            dimension_semantics=("parallel",),
            vmem_limit_bytes=vmem_limit),
    )(x_p, w1_p, g1_p, b1_p, w2_p, g2_p, b2_p, wcat)

    return out_p[:n, :cout].astype(x2d.dtype)


def init_params(key, in_channels, out_channels):
    hid = 2 * in_channels
    k1, k2, k3, k4 = jax.random.split(key, 4)
    scale = lambda fan_in: 1.0 / jnp.sqrt(fan_in)
    # weights stored as [in_features, out_features] (PyTorch weight transposed)
    w1 = jax.random.uniform(k1, (in_channels, hid), jnp.float32,
                            -scale(in_channels), scale(in_channels))
    w2 = jax.random.uniform(k2, (hid, hid), jnp.float32, -scale(hid), scale(hid))
    w3 = jax.random.uniform(k3, (hid, out_channels), jnp.float32,
                            -scale(hid), scale(hid))
    wf = jax.random.uniform(k4, (in_channels, out_channels), jnp.float32,
                            -scale(in_channels), scale(in_channels))
    # LayerNorm init matches PyTorch defaults: gamma=1, beta=0
    g1 = jnp.ones((1, hid), jnp.float32)
    b1 = jnp.zeros((1, hid), jnp.float32)
    g2 = jnp.ones((1, hid), jnp.float32)
    b2 = jnp.zeros((1, hid), jnp.float32)
    return (w1, g1, b1, w2, g2, b2, w3, wf)


def projector_forward(x, params):
    """x: [..., in_channels]; flattens leading dims, runs kernel, restores shape."""
    lead = x.shape[:-1]
    x2d = x.reshape(-1, x.shape[-1])
    out2d = projector_pallas(x2d, params)
    return out2d.reshape(*lead, out2d.shape[-1])


def projector_ref(x, params):
    """bf16-matched JAX reference (same MXU operand precision as the kernel)."""
    w1, g1, b1, w2, g2, b2, w3, wf = params
    bf = jnp.bfloat16
    x2d = x.reshape(-1, x.shape[-1]).astype(bf)

    def ln(h, g, b):
        mu = jnp.mean(h, -1, keepdims=True)
        var = jnp.maximum(jnp.mean(h * h, -1, keepdims=True) - mu * mu, 0.0)
        return (h - mu) * jax.lax.rsqrt(var + LN_EPS) * g + b

    def lrelu(h):
        return jnp.where(h > 0, h, LEAKY_SLOPE * h)

    h = jnp.dot(x2d, w1.astype(bf), preferred_element_type=jnp.float32)
    h = lrelu(ln(h, g1, b1))
    h = jnp.dot(h.astype(bf), w2.astype(bf), preferred_element_type=jnp.float32)
    h = lrelu(ln(h, g2, b2))
    out = jnp.dot(h.astype(bf), w3.astype(bf), preferred_element_type=jnp.float32)
    out = out + jnp.dot(x2d, wf.astype(bf), preferred_element_type=jnp.float32)
    return out.reshape(*x.shape[:-1], out.shape[-1])


if __name__ == "__main__":
    in_channels, out_channels = 32, 32
    batch, seq = 2, 8                       # 16 rows total

    key = jax.random.PRNGKey(0)
    kx, kp = jax.random.split(key)
    x = jax.random.normal(kx, (batch, seq, in_channels), jnp.float32)
    params = init_params(kp, in_channels, out_channels)

    out = projector_forward(x, params)
    jax.block_until_ready(out)

    ref = projector_ref(x, params)
    assert out.shape == (batch, seq, out_channels)
    assert jnp.allclose(out, ref, atol=2e-3, rtol=2e-3), "mismatch vs reference"

    print("KERNEL_OK")
</pallas_src>

<mosaic_0001>
module attributes {stable_mosaic.version = 11 : i64} {
  func.func @projector_kernel(%arg0: i32, %arg1: memref<16x128xbf16, #tpu.memory_space<vmem>>, %arg2: memref<128x128xbf16, #tpu.memory_space<vmem>>, %arg3: memref<1x128xf32, #tpu.memory_space<vmem>>, %arg4: memref<1x128xf32, #tpu.memory_space<vmem>>, %arg5: memref<128x128xbf16, #tpu.memory_space<vmem>>, %arg6: memref<1x128xf32, #tpu.memory_space<vmem>>, %arg7: memref<1x128xf32, #tpu.memory_space<vmem>>, %arg8: memref<256x128xbf16, #tpu.memory_space<vmem>>, %arg9: memref<16x128xf32, #tpu.memory_space<vmem>>) attributes {dimension_semantics = [#tpu.dimension_semantics<parallel>], iteration_bounds = array<i64: 1>, scalar_prefetch = 0 : i64, scratch_operands = 0 : i64, tpu.core_type = #tpu.core_type<tc>, window_params = [{transform_indices = @transform_0, window_bounds = array<i64: 16, 128>}, {pipeline_mode = #tpu.pipeline_mode<synchronous>, transform_indices = @transform_1, window_bounds = array<i64: 128, 128>}, {pipeline_mode = #tpu.pipeline_mode<synchronous>, transform_indices = @transform_2, window_bounds = array<i64: 1, 128>}, {pipeline_mode = #tpu.pipeline_mode<synchronous>, transform_indices = @transform_3, window_bounds = array<i64: 1, 128>}, {pipeline_mode = #tpu.pipeline_mode<synchronous>, transform_indices = @transform_4, window_bounds = array<i64: 128, 128>}, {pipeline_mode = #tpu.pipeline_mode<synchronous>, transform_indices = @transform_5, window_bounds = array<i64: 1, 128>}, {pipeline_mode = #tpu.pipeline_mode<synchronous>, transform_indices = @transform_6, window_bounds = array<i64: 1, 128>}, {pipeline_mode = #tpu.pipeline_mode<synchronous>, transform_indices = @transform_7, window_bounds = array<i64: 256, 128>}, {transform_indices = @transform_8, window_bounds = array<i64: 16, 128>}]} {
    %c0 = arith.constant 0 : index
    %c0_0 = arith.constant 0 : index
    %0 = vector.load %arg1[%c0, %c0_0] : memref<16x128xbf16, #tpu.memory_space<vmem>>, vector<16x128xbf16>
    %c0_1 = arith.constant 0 : index
    %c0_2 = arith.constant 0 : index
    %1 = vector.load %arg2[%c0_1, %c0_2] : memref<128x128xbf16, #tpu.memory_space<vmem>>, vector<128x128xbf16>
    %cst = arith.constant dense<0.000000e+00> : vector<16x128xf32>
    %2 = tpu.matmul %0, %1, %cst {dimension_numbers = #tpu.dot_dimension_numbers<[1], [0], [0], [1], [0, 0, 1, 1], [], []>} : vector<16x128xbf16>, vector<128x128xbf16>, vector<16x128xf32> -> vector<16x128xf32>
    %c0_3 = arith.constant 0 : index
    %c0_4 = arith.constant 0 : index
    %3 = vector.load %arg3[%c0_3, %c0_4] : memref<1x128xf32, #tpu.memory_space<vmem>>, vector<1x128xf32>
    %c0_5 = arith.constant 0 : index
    %c0_6 = arith.constant 0 : index
    %4 = vector.load %arg4[%c0_5, %c0_6] : memref<1x128xf32, #tpu.memory_space<vmem>>, vector<1x128xf32>
    %cst_7 = arith.constant dense<0.000000e+00> : vector<16xf32>
    %5 = vector.multi_reduction <add>, %2, %cst_7 [1] : vector<16x128xf32> to vector<16xf32>
    %6 = vector.shape_cast %5 : vector<16xf32> to vector<16x1xf32>
    %cst_8 = arith.constant 1.562500e-02 : f32
    %7 = vector.broadcast %cst_8 : f32 to vector<16x1xf32>
    %8 = arith.mulf %6, %7 : vector<16x1xf32>
    %9 = arith.mulf %2, %2 : vector<16x128xf32>
    %cst_9 = arith.constant dense<0.000000e+00> : vector<16xf32>
    %10 = vector.multi_reduction <add>, %9, %cst_9 [1] : vector<16x128xf32> to vector<16xf32>
    %11 = vector.shape_cast %10 : vector<16xf32> to vector<16x1xf32>
    %cst_10 = arith.constant 1.562500e-02 : f32
    %12 = vector.broadcast %cst_10 : f32 to vector<16x1xf32>
    %13 = arith.mulf %11, %12 : vector<16x1xf32>
    %14 = arith.mulf %8, %8 : vector<16x1xf32>
    %15 = arith.subf %13, %14 : vector<16x1xf32>
    %cst_11 = arith.constant 0.000000e+00 : f32
    %16 = vector.broadcast %cst_11 : f32 to vector<16x1xf32>
    %17 = arith.maximumf %15, %16 : vector<16x1xf32>
    %18 = vector.broadcast %8 : vector<16x1xf32> to vector<16x128xf32>
    %19 = arith.subf %2, %18 : vector<16x128xf32>
    %cst_12 = arith.constant 9.99999974E-6 : f32
    %20 = vector.broadcast %cst_12 : f32 to vector<16x1xf32>
    %21 = arith.addf %17, %20 : vector<16x1xf32>
    %22 = math.rsqrt %21 : vector<16x1xf32>
    %23 = vector.broadcast %22 : vector<16x1xf32> to vector<16x128xf32>
    %24 = arith.mulf %19, %23 : vector<16x128xf32>
    %25 = vector.broadcast %3 : vector<1x128xf32> to vector<16x128xf32>
    %26 = arith.mulf %24, %25 : vector<16x128xf32>
    %27 = vector.broadcast %4 : vector<1x128xf32> to vector<16x128xf32>
    %28 = arith.addf %26, %27 : vector<16x128xf32>
    %cst_13 = arith.constant 0.000000e+00 : f32
    %29 = vector.broadcast %cst_13 : f32 to vector<16x128xf32>
    %30 = arith.cmpf ogt, %28, %29 : vector<16x128xf32>
    %cst_14 = arith.constant 1.000000e-01 : f32
    %31 = vector.broadcast %cst_14 : f32 to vector<16x128xf32>
    %32 = arith.mulf %31, %28 : vector<16x128xf32>
    %33 = arith.select %30, %28, %32 : vector<16x128xi1>, vector<16x128xf32>
    %34 = arith.truncf %33 : vector<16x128xf32> to vector<16x128xbf16>
    %c0_15 = arith.constant 0 : index
    %c0_16 = arith.constant 0 : index
    %35 = vector.load %arg5[%c0_15, %c0_16] : memref<128x128xbf16, #tpu.memory_space<vmem>>, vector<128x128xbf16>
    %cst_17 = arith.constant dense<0.000000e+00> : vector<16x128xf32>
    %36 = tpu.matmul %34, %35, %cst_17 {dimension_numbers = #tpu.dot_dimension_numbers<[1], [0], [0], [1], [0, 0, 1, 1], [], []>} : vector<16x128xbf16>, vector<128x128xbf16>, vector<16x128xf32> -> vector<16x128xf32>
    %c0_18 = arith.constant 0 : index
    %c0_19 = arith.constant 0 : index
    %37 = vector.load %arg6[%c0_18, %c0_19] : memref<1x128xf32, #tpu.memory_space<vmem>>, vector<1x128xf32>
    %c0_20 = arith.constant 0 : index
    %c0_21 = arith.constant 0 : index
    %38 = vector.load %arg7[%c0_20, %c0_21] : memref<1x128xf32, #tpu.memory_space<vmem>>, vector<1x128xf32>
    %cst_22 = arith.constant dense<0.000000e+00> : vector<16xf32>
    %39 = vector.multi_reduction <add>, %36, %cst_22 [1] : vector<16x128xf32> to vector<16xf32>
    %40 = vector.shape_cast %39 : vector<16xf32> to vector<16x1xf32>
    %cst_23 = arith.constant 1.562500e-02 : f32
    %41 = vector.broadcast %cst_23 : f32 to vector<16x1xf32>
    %42 = arith.mulf %40, %41 : vector<16x1xf32>
    %43 = arith.mulf %36, %36 : vector<16x128xf32>
    %cst_24 = arith.constant dense<0.000000e+00> : vector<16xf32>
    %44 = vector.multi_reduction <add>, %43, %cst_24 [1] : vector<16x128xf32> to vector<16xf32>
    %45 = vector.shape_cast %44 : vector<16xf32> to vector<16x1xf32>
    %cst_25 = arith.constant 1.562500e-02 : f32
    %46 = vector.broadcast %cst_25 : f32 to vector<16x1xf32>
    %47 = arith.mulf %45, %46 : vector<16x1xf32>
    %48 = arith.mulf %42, %42 : vector<16x1xf32>
    %49 = arith.subf %47, %48 : vector<16x1xf32>
    %cst_26 = arith.constant 0.000000e+00 : f32
    %50 = vector.broadcast %cst_26 : f32 to vector<16x1xf32>
    %51 = arith.maximumf %49, %50 : vector<16x1xf32>
    %52 = vector.broadcast %42 : vector<16x1xf32> to vector<16x128xf32>
    %53 = arith.subf %36, %52 : vector<16x128xf32>
    %cst_27 = arith.constant 9.99999974E-6 : f32
    %54 = vector.broadcast %cst_27 : f32 to vector<16x1xf32>
    %55 = arith.addf %51, %54 : vector<16x1xf32>
    %56 = math.rsqrt %55 : vector<16x1xf32>
    %57 = vector.broadcast %56 : vector<16x1xf32> to vector<16x128xf32>
    %58 = arith.mulf %53, %57 : vector<16x128xf32>
    %59 = vector.broadcast %37 : vector<1x128xf32> to vector<16x128xf32>
    %60 = arith.mulf %58, %59 : vector<16x128xf32>
    %61 = vector.broadcast %38 : vector<1x128xf32> to vector<16x128xf32>
    %62 = arith.addf %60, %61 : vector<16x128xf32>
    %cst_28 = arith.constant 0.000000e+00 : f32
    %63 = vector.broadcast %cst_28 : f32 to vector<16x128xf32>
    %64 = arith.cmpf ogt, %62, %63 : vector<16x128xf32>
    %cst_29 = arith.constant 1.000000e-01 : f32
    %65 = vector.broadcast %cst_29 : f32 to vector<16x128xf32>
    %66 = arith.mulf %65, %62 : vector<16x128xf32>
    %67 = arith.select %64, %62, %66 : vector<16x128xi1>, vector<16x128xf32>
    %68 = arith.truncf %67 : vector<16x128xf32> to vector<16x128xbf16>
    %69 = tpu.concatenate %68, %0 in 1 : vector<16x128xbf16>, vector<16x128xbf16> -> vector<16x256xbf16>
    %c0_30 = arith.constant 0 : index
    %c0_31 = arith.constant 0 : index
    %70 = vector.load %arg8[%c0_30, %c0_31] : memref<256x128xbf16, #tpu.memory_space<vmem>>, vector<256x128xbf16>
    %cst_32 = arith.constant dense<0.000000e+00> : vector<16x128xf32>
    %71 = tpu.matmul %69, %70, %cst_32 {dimension_numbers = #tpu.dot_dimension_numbers<[1], [0], [0], [1], [0, 0, 1, 1], [], []>} : vector<16x256xbf16>, vector<256x128xbf16>, vector<16x128xf32> -> vector<16x128xf32>
    %c0_33 = arith.constant 0 : index
    %c0_34 = arith.constant 0 : index
    %72 = vector.load %arg9[%c0_33, %c0_34] : memref<16x128xf32, #tpu.memory_space<vmem>>, vector<16x128xf32>
    tpu.vector_store %arg9[%c0_33, %c0_34], %71 {strides = array<i32>} : memref<16x128xf32, #tpu.memory_space<vmem>>, vector<16x128xf32>,
    return
  }
  func.func @transform_0(%arg0: i32) -> (i32, i32) {
    %c0_i32 = arith.constant 0 : i32
    %c0_i32_0 = arith.constant 0 : i32
    return %arg0, %c0_i32 : i32, i32
  }
  func.func @transform_1(%arg0: i32) -> (i32, i32) {
    %c0_i32 = arith.constant 0 : i32
    %c0_i32_0 = arith.constant 0 : i32
    %c0_i32_1 = arith.constant 0 : i32
    return %c0_i32, %c0_i32_0 : i32, i32
  }
  func.func @transform_2(%arg0: i32) -> (i32, i32) {
    %c0_i32 = arith.constant 0 : i32
    %c0_i32_0 = arith.constant 0 : i32
    %c0_i32_1 = arith.constant 0 : i32
    return %c0_i32, %c0_i32_0 : i32, i32
  }
  func.func @transform_3(%arg0: i32) -> (i32, i32) {
    %c0_i32 = arith.constant 0 : i32
    %c0_i32_0 = arith.constant 0 : i32
    %c0_i32_1 = arith.constant 0 : i32
    return %c0_i32, %c0_i32_0 : i32, i32
  }
  func.func @transform_4(%arg0: i32) -> (i32, i32) {
    %c0_i32 = arith.constant 0 : i32
    %c0_i32_0 = arith.constant 0 : i32
    %c0_i32_1 = arith.constant 0 : i32
    return %c0_i32, %c0_i32_0 : i32, i32
  }
  func.func @transform_5(%arg0: i32) -> (i32, i32) {
    %c0_i32 = arith.constant 0 : i32
    %c0_i32_0 = arith.constant 0 : i32
    %c0_i32_1 = arith.constant 0 : i32
    return %c0_i32, %c0_i32_0 : i32, i32
  }
  func.func @transform_6(%arg0: i32) -> (i32, i32) {
    %c0_i32 = arith.constant 0 : i32
    %c0_i32_0 = arith.constant 0 : i32
    %c0_i32_1 = arith.constant 0 : i32
    return %c0_i32, %c0_i32_0 : i32, i32
  }
  func.func @transform_7(%arg0: i32) -> (i32, i32) {
    %c0_i32 = arith.constant 0 : i32
    %c0_i32_0 = arith.constant 0 : i32
    %c0_i32_1 = arith.constant 0 : i32
    return %c0_i32, %c0_i32_0 : i32, i32
  }
  func.func @transform_8(%arg0: i32) -> (i32, i32) {
    %c0_i32 = arith.constant 0 : i32
    %c0_i32_0 = arith.constant 0 : i32
    return %arg0, %c0_i32 : i32, i32
  }
}

</mosaic_0001>

<bundles_post_ra>
// kernel: tpu_custom_call.1
= control target key start
LH: loop header
LB: loop body
LE: loop exit
PB: predicated region body
PF: predicated region fallthrough
CT: control target
= control target key end

     0   :  { %13 = vsyncpa [#allocation3], 0  ;;  %s1053_s0 = inlined_call_operand.hbm [shape: bf16[16,128], index: 0, kind: input, shape index: {}]   ;;  %s1054_s1 = inlined_call_operand.hbm [shape: bf16[128,128], index: 1, kind: input, shape index: {}]   ;;  %s1055_s2 = inlined_call_operand.vmem [shape: f32[1,128], index: 2, kind: input, shape index: {}]   ;;  %s1056_s3 = inlined_call_operand.vmem [shape: f32[1,128], index: 3, kind: input, shape index: {}]   ;;  %s1057_s4 = inlined_call_operand.hbm [shape: bf16[128,128], index: 4, kind: input, shape index: {}]   ;;  %s1058_s5 = inlined_call_operand.vmem [shape: f32[1,128], index: 5, kind: input, shape index: {}]   ;;  %s1059_s6 = inlined_call_operand.vmem [shape: f32[1,128], index: 6, kind: input, shape index: {}]   ;;  %s1060_s7 = inlined_call_operand.hbm [shape: bf16[256,128], index: 7, kind: input, shape index: {}]   ;;  %s1061_s8 = inlined_call_operand.hbm [shape: f32[16,128], index: 8, kind: output, shape index: {}]  }
   0x1   :  { %14 = vsyncpa [#allocation6], 0 }
   0x2   :  { %15 = vsyncpa [#allocation9], 0 }
   0x3   :  { %16 = vsyncpa [#allocation4], 0  ;;  %s887_s27 = smov [#allocation5]   ;;  %s888_s29 = smov [#allocation2]  }
   0x4   :  { %s34_s28 = sshll.u32 %s887_s27, 4  ;;  %s22_s30 = sshll.u32 %s888_s29, 4  ;;  %s35_s28 = int_to_ptr.vmem [resolvable:$true] %s34_s28  ;;  %s943_s30 = int_to_ptr.vmem [resolvable:$true] %s22_s30 }
   0x5   :  { %s769_s11 = scalar_lea.hbm %s1054_s1, 1024 }
   0x6   :  { %p770_p0 = scmp.ne.s32.totalorder %s1054_s1, %s769_s11  ;;  %p773_p1 = scmp.lt.u32.totalorder %s769_s11, %s1054_s1 }
   0x8   :  { %p775_p2 = pnand %p773_p1, %p770_p0 }
   0xa   :  { %778 = shalt.err (!%p775_p2)
}
   0xb   :  { %s779_s16 = scalar_lea.vmem %s35_s28, 1024  ;;  %p784_p4 = scmp.lt.s32.totalorder %s35_s28, %s35_s28 }
   0xc   :  { %p780_p3 = scmp.ne.s32.totalorder %s35_s28, %s779_s16  ;;  %p785_p5 = scmp.lt.s32.totalorder %s779_s16, %s779_s16 }
   0xe   :  { %p786_p6 = por %p785_p5, %p784_p4 }
  0x10   :  { %p787_p7 = pnand %p786_p6, %p780_p3 }
  0x12   :  { %790 = shalt.err (!%p787_p7)
}
  0x13   :  { %s889_s17 = smov 64   ;;  %s890_s18 = smov 4  }
  0x14   :  { %40 = dma.hbm_to_vmem [thread:$0]  %s1054_s1, 1024, %s35_s28, [#allocation6], %s889_s17, %s889_s17, %s890_s18  }
  0x15   :  { %s791_s23 = scalar_lea.hbm %s1053_s0, 128 }
  0x16   :  { %p792_p8 = scmp.ne.s32.totalorder %s1053_s0, %s791_s23  ;;  %p795_p9 = scmp.lt.u32.totalorder %s791_s23, %s1053_s0 }
  0x18   :  { %p797_p10 = pnand %p795_p9, %p792_p8 }
  0x1a   :  { %800 = shalt.err (!%p797_p10)
}
  0x1b   :  { %s801_s29 = scalar_lea.vmem %s943_s30, 128  ;;  %p806_p12 = scmp.lt.s32.totalorder %s943_s30, %s943_s30 }
  0x1c   :  { %p802_p11 = scmp.ne.s32.totalorder %s943_s30, %s801_s29  ;;  %p807_p13 = scmp.lt.s32.totalorder %s801_s29, %s801_s29 }
  0x1e   :  { %p808_p0 = por %p807_p13, %p806_p12 }
  0x20   :  { %p809_p1 = pnand %p808_p0, %p802_p11 }
  0x22   :  { %812 = shalt.err (!%p809_p1)
}
  0x23   :  { %28 = dma.hbm_to_vmem [thread:$0]  %s1053_s0, 128, %s943_s30, [#allocation3], %s889_s17, %s889_s17, %s890_s18  }
  0x24   :  { %s891_s9 = smov [#allocation7]   ;;  %s892_s11 = smov [#allocation8]  }
  0x25   :  { %s50_s10 = sshll.u32 %s891_s9, 4  ;;  %s66_s12 = sshll.u32 %s892_s11, 4  ;;  %s51_s10 = int_to_ptr.vmem [resolvable:$true] %s50_s10  ;;  %s980_s12 = int_to_ptr.vmem [resolvable:$true] %s66_s12 }
  0x26   :  { %s813_s15 = scalar_lea.hbm %s1057_s4, 1024 }
  0x27   :  { %p814_p2 = scmp.ne.s32.totalorder %s1057_s4, %s813_s15  ;;  %p817_p3 = scmp.lt.u32.totalorder %s813_s15, %s1057_s4 }
  0x29   :  { %p819_p4 = pnand %p817_p3, %p814_p2 }
  0x2b   :  { %822 = shalt.err (!%p819_p4)
}
  0x2c   :  { %s823_s0 = scalar_lea.vmem %s51_s10, 1024  ;;  %p828_p6 = scmp.lt.s32.totalorder %s51_s10, %s51_s10 }
  0x2d   :  { %p824_p5 = scmp.ne.s32.totalorder %s51_s10, %s823_s0  ;;  %p829_p7 = scmp.lt.s32.totalorder %s823_s0, %s823_s0 }
  0x2f   :  { %p830_p8 = por %p829_p7, %p828_p6 }
  0x31   :  { %p831_p9 = pnand %p830_p8, %p824_p5 }
  0x33   :  { %834 = shalt.err (!%p831_p9)
}
  0x34   :  { %56 = dma.hbm_to_vmem [thread:$0]  %s1057_s4, 1024, %s51_s10, [#allocation6], %s889_s17, %s889_s17, %s890_s18  }
  0x35   :  { %s835_s25 = scalar_lea.hbm %s1060_s7, 2048 }
  0x36   :  { %p836_p10 = scmp.ne.s32.totalorder %s1060_s7, %s835_s25  ;;  %p839_p11 = scmp.lt.u32.totalorder %s835_s25, %s1060_s7 }
  0x38   :  { %p841_p12 = pnand %p839_p11, %p836_p10 }
  0x3a   :  { %844 = shalt.err (!%p841_p12)
}
  0x3b   :  { %s845_s28 = scalar_lea.vmem %s980_s12, 2048  ;;  %p850_p0 = scmp.lt.s32.totalorder %s980_s12, %s980_s12 }
  0x3c   :  { %p846_p13 = scmp.ne.s32.totalorder %s980_s12, %s845_s28  ;;  %p851_p1 = scmp.lt.s32.totalorder %s845_s28, %s845_s28 }
  0x3e   :  { %p852_p2 = por %p851_p1, %p850_p0 }
  0x40   :  { %p853_p3 = pnand %p852_p2, %p846_p13 }
  0x42   :  { %856 = shalt.err (!%p853_p3)
}
  0x43   :  { %72 = dma.hbm_to_vmem [thread:$0]  %s1060_s7, 2048, %s980_s12, [#allocation9], %s889_s17, %s889_s17, %s890_s18  }
  0x44   :  { %879 = dma.done.wait [#allocation3], 128  }
  0x45   :  { %880 = vsyncadd [#allocation3], 4294967168 }
  0x46   :  { %881 = dma.done.wait [#allocation6], 2048  }
  0x47   :  { %882 = vsyncadd [#allocation6], 4294965248 }
  0x48   :  { %883 = dma.done.wait [#allocation9], 2048  }
  0x49   :  { %884 = vsyncadd [#allocation9], 4294965248  ;;  %v893_v0 = vmov 0.0   ;;  %vm894_vm0 = vmmov 0   ;;  %v728_v1 = vld [vmem:[#allocation5] sm:$0xff]   ;;  %v729_v2 = vld [vmem:[#allocation5 + $0x8] sm:$0xff]  }
  0x4a   :  { %677 = vmatprep.subr.bf16.mxu0 %v893_v0  ;;  %693 = vmatprep.mubr.msk.bf16.mxu0 %vm894_vm0, %v893_v0  ;;  %v730_v3 = vld [vmem:[#allocation5 + $0x10] sm:$0xff]   ;;  %v731_v4 = vld [vmem:[#allocation5 + $0x18] sm:$0xff]   ;;  %v732_v5 = vld [vmem:[#allocation5 + $0x20] sm:$0xff]  }
  0x4b   :  { %697 = vmatprep.subr.bf16.mxu1 %v893_v0  ;;  %713 = vmatprep.mubr.msk.bf16.mxu1 %vm894_vm0, %v893_v0  ;;  %v733_v6 = vld [vmem:[#allocation5 + $0x28] sm:$0xff]   ;;  %v734_v7 = vld [vmem:[#allocation5 + $0x30] sm:$0xff]   ;;  %v735_v8 = vld [vmem:[#allocation5 + $0x38] sm:$0xff]  }
  0x4c   :  { %678 = vmatpush3.bf16.msra.mxu0 %v728_v1  ;;  %v736_v9 = vld [vmem:[#allocation2] sm:$0xff]   ;;  %v737_v16 = vld [vmem:[#allocation7] sm:$0xff]   ;;  %v738_v17 = vld [vmem:[#allocation7 + $0x8] sm:$0xff]  }
  0x4d   :  { %679 = vmatprep.subr.bf16.mxu0 %v893_v0  ;;  %698 = vmatpush3.bf16.msra.mxu1 %v737_v16  ;;  %v739_v18 = vld [vmem:[#allocation7 + $0x10] sm:$0xff]   ;;  %v740_v19 = vld [vmem:[#allocation7 + $0x18] sm:$0xff]   ;;  %v741_v20 = vld [vmem:[#allocation7 + $0x20] sm:$0xff]  }
  0x4e   :  { %699 = vmatprep.subr.bf16.mxu1 %v893_v0  ;;  %v742_v21 = vld [vmem:[#allocation7 + $0x28] sm:$0xff]   ;;  %v743_v22 = vld [vmem:[#allocation7 + $0x30] sm:$0xff]   ;;  %v744_v23 = vld [vmem:[#allocation7 + $0x38] sm:$0xff]  }
  0x4f   :  { %v609_v42 = vld [vmem:[%s1055_s2] ss:$0 sm:$0xff]  ;;  %v745_v63 = vld [vmem:[#allocation8 + $0x40] sm:$0xff]   ;;  %v747_v1 = vld [vmem:[#allocation8 + $0x48] sm:$0xff]  }
  0x50   :  { %680 = vmatpush3.bf16.msra.mxu0 %v729_v2  ;;  %v610_v44 = vld [vmem:[%s1056_s3] ss:$0 sm:$0xff]  ;;  %v748_v2 = vld [vmem:[#allocation8 + $0x8] sm:$0xff]  }
  0x51   :  { %681 = vmatprep.subr.bf16.mxu0 %v893_v0  ;;  %700 = vmatpush3.bf16.msra.mxu1 %v738_v17 }
  0x52   :  { %701 = vmatprep.subr.bf16.mxu1 %v893_v0 }
  0x54   :  { %682 = vmatpush3.bf16.msra.mxu0 %v730_v3  ;;  %v749_v3 = vld [vmem:[#allocation8 + $0x50] sm:$0xff]  }
  0x55   :  { %683 = vmatprep.subr.bf16.mxu0 %v893_v0  ;;  %702 = vmatpush3.bf16.msra.mxu1 %v739_v18 }
  0x56   :  { %703 = vmatprep.subr.bf16.mxu1 %v893_v0 }
  0x58   :  { %684 = vmatpush3.bf16.msra.mxu0 %v731_v4  ;;  %v750_v4 = vld [vmem:[#allocation8 + $0x10] sm:$0xff]  }
  0x59   :  { %685 = vmatprep.subr.bf16.mxu0 %v893_v0  ;;  %704 = vmatpush3.bf16.msra.mxu1 %v740_v19 }
  0x5a   :  { %705 = vmatprep.subr.bf16.mxu1 %v893_v0 }
  0x5c   :  { %686 = vmatpush3.bf16.msra.mxu0 %v732_v5  ;;  %v751_v5 = vld [vmem:[#allocation8 + $0x58] sm:$0xff]  }
  0x5d   :  { %687 = vmatprep.subr.bf16.mxu0 %v893_v0  ;;  %706 = vmatpush3.bf16.msra.mxu1 %v741_v20 }
  0x5e   :  { %707 = vmatprep.subr.bf16.mxu1 %v893_v0 }
  0x60   :  { %688 = vmatpush3.bf16.msra.mxu0 %v733_v6  ;;  %v752_v6 = vld [vmem:[#allocation8 + $0x18] sm:$0xff]  }
  0x61   :  { %689 = vmatprep.subr.bf16.mxu0 %v893_v0  ;;  %708 = vmatpush3.bf16.msra.mxu1 %v742_v21 }
  0x62   :  { %709 = vmatprep.subr.bf16.mxu1 %v893_v0 }
  0x64   :  { %690 = vmatpush3.bf16.msra.mxu0 %v734_v7  ;;  %v753_v7 = vld [vmem:[#allocation8 + $0x60] sm:$0xff]  }
  0x65   :  { %691 = vmatprep.subr.bf16.mxu0 %v893_v0  ;;  %710 = vmatpush3.bf16.msra.mxu1 %v743_v22 }
  0x66   :  { %711 = vmatprep.subr.bf16.mxu1 %v893_v0  ;;  %v746_v0 = vld [vmem:[#allocation8] sm:$0xff]  }
  0x68   :  { %692 = vmatpush3.bf16.msra.mxu0 %v735_v8  ;;  %v754_v8 = vld [vmem:[#allocation8 + $0x20] sm:$0xff]  }
  0x69   :  { %712 = vmatpush3.bf16.msra.mxu1 %v744_v23  ;;  %655 = vmatprep.subr.bf16.mxu0 %v745_v63 }
  0x6b   :  { %694 = vmatmul.mubr.bf16.vlgmr.msra.gmra.mrb[0].mxu0 %v736_v9 }
  0x6c   :  { %570 = vmatprep.mubr.bf16.mxu0 %v736_v9  ;;  %656 = vmatpush3.bf16.msra.mxu0 %v746_v0  ;;  %v755_v9 = vld [vmem:[#allocation8 + $0x68] sm:$0xff]  }
  0x6d   :  { %657 = vmatprep.subr.bf16.mxu0 %v747_v1 }
  0x70   :  { %658 = vmatpush3.bf16.msra.mxu0 %v748_v2 }
  0x71   :  { %659 = vmatprep.subr.bf16.mxu0 %v749_v3 }
  0x74   :  { %660 = vmatpush3.bf16.msra.mxu0 %v750_v4 }
  0x75   :  { %661 = vmatprep.subr.bf16.mxu0 %v751_v5 }
  0x78   :  { %662 = vmatpush3.bf16.msra.mxu0 %v752_v6 }
  0x79   :  { %663 = vmatprep.subr.bf16.mxu0 %v753_v7 }
  0x7c   :  { %664 = vmatpush3.bf16.msra.mxu0 %v754_v8 }
  0x7d   :  { %665 = vmatprep.subr.bf16.mxu0 %v755_v9 }
 0x13e   :  { %v192_v10 = vpop.f32.mrb[0].mxu0 }
 0x13f   :  { %201 = vadd.xlane.f32.xlu0 %v192_v10  ;;  %v695_v11 = vpop.f32.mrb[1].mxu0  ;;  %v207_v12 = vmul.f32 %v192_v10, %v192_v10 }
 0x140   :  { %v195_v13 = vpop.f32.mrb[2].mxu0  ;;  %v757_v11 = vld [vmem:[#allocation8 + $0x70] sm:$0xff]  }
 0x141   :  { %209 = vadd.xlane.f32.xlu1 %v207_v12  ;;  %v696_v14 = vpop.f32.mrb[3].mxu0  ;;  %v208_v15 = vmul.f32 %v195_v13, %v195_v13  ;;  %v758_v12 = vld [vmem:[#allocation8 + $0x30] sm:$0xff]  }
 0x142   :  { %v760_v14 = vld [vmem:[#allocation8 + $0x38] sm:$0xff]  }
 0x143   :  { %203 = vadd.xlane.f32.xlu0 %v195_v13 }
 0x145   :  { %211 = vadd.xlane.f32.xlu1 %v208_v15 }
 0x1cc   :  { %v202_v24 = vpop.xlane.xlu0 %201 }
 0x1cd   :  { %v205_v25 = vmul.f32 0.015625, %v202_v24 }
 0x1ce   :  { %v210_v26 = vpop.xlane.xlu1 %209 }
 0x1cf   :  { %v215_v27 = vmul.f32 %v205_v25, %v205_v25  ;;  %v213_v28 = vmul.f32 0.015625, %v210_v26  ;;  %v221_v40 = vsub.f32 %v192_v10, %v205_v25  ;;  %v756_v10 = vld [vmem:[#allocation8 + $0x28] sm:$0xff]  }
 0x1d0   :  { %v204_v29 = vpop.xlane.xlu0 %203  ;;  %666 = vmatpush3.bf16.msra.mxu0 %v756_v10 }
 0x1d1   :  { %v217_v30 = vsub.f32 %v213_v28, %v215_v27  ;;  %v206_v31 = vmul.f32 0.015625, %v204_v29  ;;  %667 = vmatprep.subr.bf16.mxu0 %v757_v11 }
 0x1d2   :  { %v212_v32 = vpop.xlane.xlu1 %211 }
 0x1d3   :  { %v219_v33 = vmax.f32 %v217_v30, 0.0  ;;  %v216_v34 = vmul.f32 %v206_v31, %v206_v31  ;;  %v214_v35 = vmul.f32 0.015625, %v212_v32  ;;  %v222_v45 = vsub.f32 %v195_v13, %v206_v31  ;;  %v759_v13 = vld [vmem:[#allocation8 + $0x78] sm:$0xff]  }
 0x1d4   :  { %668 = vmatpush3.bf16.msra.mxu0 %v758_v12 }
 0x1d5   :  { %v223_v36 = vadd.f32 1e-05, %v219_v33  ;;  %v218_v37 = vsub.f32 %v214_v35, %v216_v34  ;;  %669 = vmatprep.subr.bf16.mxu0 %v759_v13  ;;  %v619_v33 = vld [vmem:[%s1058_s5] ss:$0 sm:$0xff]  ;;  %s895_s5 = smov [#allocation10]  }
 0x1d6   :  { %s586_s13 = sshll.u32 %s895_s5, 4  ;;  %s587_s13 = int_to_ptr.vmem [resolvable:$true] %s586_s13 }
 0x1d7   :  { %761 = vrsqrt.f32 %v223_v36  ;;  %v220_v38 = vmax.f32 %v218_v37, 0.0  ;;  %v620_v37 = vld [vmem:[%s1059_s6] ss:$0 sm:$0xff]  ;;  %s857_s6 = scalar_lea.vmem %s587_s13, 256  ;;  %p862_p5 = scmp.lt.s32.totalorder %s587_s13, %s587_s13 }
 0x1d8   :  { %670 = vmatpush3.bf16.msra.mxu0 %v760_v14  ;;  %p858_p4 = scmp.ne.s32.totalorder %s587_s13, %s857_s6  ;;  %p863_p6 = scmp.lt.s32.totalorder %s857_s6, %s857_s6 }
 0x1d9   :  { %v224_v39 = vadd.f32 1e-05, %v220_v38 }
 0x1da   :  { %p864_p7 = por %p863_p6, %p862_p5 }
 0x1db   :  { %763 = vrsqrt.f32 %v224_v39 }
 0x1dc   :  { %p865_p8 = pnand %p864_p7, %p858_p4 }
 0x1e1   :  { %v762_v41 = vpop.eup %761 }
 0x1e2   :  { %v227_v43 = vmul.f32 %v762_v41, %v221_v40 }
 0x1e4   :  { %v235_v46 = vmul.f32 %v609_v42, %v227_v43 }
 0x1e5   :  { %v764_v47 = vpop.eup %763 }
 0x1e6   :  { %v228_v48 = vmul.f32 %v764_v47, %v222_v45  ;;  %v243_v49 = vadd.f32 %v610_v44, %v235_v46 }
 0x1e8   :  { %v236_v50 = vmul.f32 %v609_v42, %v228_v48  ;;  %v247_v52 = vmul.f32 0.1, %v243_v49  ;;  %vm245_vm1 = vcmp.gt.f32.partialorder %v243_v49, 0.0 }
 0x1ea   :  { %v244_v51 = vadd.f32 %v610_v44, %v236_v50  ;;  %v249_v54 = vsel %vm245_vm1, %v243_v49, %v247_v52 }
 0x1ec   :  { %vm246_vm2 = vcmp.gt.f32.partialorder %v244_v51, 0.0  ;;  %v248_v53 = vmul.f32 0.1, %v244_v51 }
 0x1ee   :  { %v250_v55 = vsel %vm246_vm2, %v244_v51, %v248_v53 }
 0x1ef   :  { %v251_v56 = vpack.c.bf16 %v250_v55, %v249_v54 }
 0x1f1   :  { %714 = vmatmul.mubr.bf16.vlgmr.msra.gmra.mrb[0].mxu1 %v251_v56 }
 0x2c4   :  { %v1023_v57 = vpop.f32.mrb[0].mxu1 }
 0x2c5   :  { %359 = vadd.xlane.f32.xlu0 %v1023_v57  ;;  %v715_v58 = vpop.f32.mrb[1].mxu1  ;;  %v365_v61 = vmul.f32 %v1023_v57, %v1023_v57 }
 0x2c6   :  { %v1026_v59 = vpop.f32.mrb[2].mxu1 }
 0x2c7   :  { %361 = vadd.xlane.f32.xlu1 %v1026_v59  ;;  %v716_v60 = vpop.f32.mrb[3].mxu1  ;;  %v366_v62 = vmul.f32 %v1026_v59, %v1026_v59 }
 0x2c9   :  { %367 = vadd.xlane.f32.xlu0 %v365_v61 }
 0x2cb   :  { %369 = vadd.xlane.f32.xlu1 %v366_v62 }
 0x352   :  { %v360_v15 = vpop.xlane.xlu0 %359 }
 0x353   :  { %v363_v16 = vmul.f32 0.015625, %v360_v15 }
 0x354   :  { %v362_v17 = vpop.xlane.xlu1 %361 }
 0x355   :  { %v364_v18 = vmul.f32 0.015625, %v362_v17  ;;  %v373_v20 = vmul.f32 %v363_v16, %v363_v16  ;;  %v379_v31 = vsub.f32 %v1023_v57, %v363_v16 }
 0x356   :  { %v368_v19 = vpop.xlane.xlu0 %367 }
 0x357   :  { %v371_v21 = vmul.f32 0.015625, %v368_v19  ;;  %v374_v23 = vmul.f32 %v364_v18, %v364_v18  ;;  %v380_v34 = vsub.f32 %v1026_v59, %v364_v18 }
 0x358   :  { %v370_v22 = vpop.xlane.xlu1 %369 }
 0x359   :  { %v375_v24 = vsub.f32 %v371_v21, %v373_v20  ;;  %v372_v25 = vmul.f32 0.015625, %v370_v22 }
 0x35b   :  { %v377_v26 = vmax.f32 %v375_v24, 0.0  ;;  %v376_v27 = vsub.f32 %v372_v25, %v374_v23 }
 0x35d   :  { %v381_v28 = vadd.f32 1e-05, %v377_v26  ;;  %v378_v29 = vmax.f32 %v376_v27, 0.0 }
 0x35f   :  { %765 = vrsqrt.f32 %v381_v28  ;;  %v382_v30 = vadd.f32 1e-05, %v378_v29 }
 0x361   :  { %767 = vrsqrt.f32 %v382_v30 }
 0x369   :  { %v766_v32 = vpop.eup %765 }
 0x36a   :  { %v385_v35 = vmul.f32 %v766_v32, %v379_v31 }
 0x36b   :  { %v768_v36 = vpop.eup %767 }
 0x36c   :  { %v386_v38 = vmul.f32 %v768_v36, %v380_v34  ;;  %v393_v39 = vmul.f32 %v619_v33, %v385_v35 }
 0x36e   :  { %v394_v40 = vmul.f32 %v619_v33, %v386_v38  ;;  %v401_v41 = vadd.f32 %v620_v37, %v393_v39 }
 0x370   :  { %v402_v42 = vadd.f32 %v620_v37, %v394_v40  ;;  %v405_v43 = vmul.f32 0.1, %v401_v41  ;;  %vm403_vm3 = vcmp.gt.f32.partialorder %v401_v41, 0.0 }
 0x372   :  { %vm404_vm4 = vcmp.gt.f32.partialorder %v402_v42, 0.0  ;;  %v406_v44 = vmul.f32 0.1, %v402_v42  ;;  %v407_v45 = vsel %vm403_vm3, %v401_v41, %v405_v43 }
 0x374   :  { %v408_v46 = vsel %vm404_vm4, %v402_v42, %v406_v44 }
 0x375   :  { %v409_v47 = vpack.c.bf16 %v408_v46, %v407_v45 }
 0x377   :  { %571 = vmatmul.mubr.bf16.vlgmr.msra.gmra.mrb[4].mxu0 %v409_v47 }
 0x44a   :  { %v671_v48 = vpop.f32.mrb[4].mxu0 }
 0x44b   :  { %v672_v49 = vpop.f32.mrb[5].mxu0 }
 0x44c   :  { %v673_v50 = vadd.f32 %v672_v49, %v671_v48  ;;  %v674_v51 = vpop.f32.mrb[6].mxu0 }
 0x44d   :  { %v675_v52 = vpop.f32.mrb[7].mxu0 }
 0x44e   :  { %579 = vst [vmem:[#allocation10] sm:$0xff] %v673_v50  ;;  %v676_v53 = vadd.f32 %v675_v52, %v674_v51 }
 0x450   :  { %580 = vst [vmem:[#allocation10 + $0x8] sm:$0xff] %v676_v53 }
 0x451   :  { %868 = shalt.err (!%p865_p8)
}
 0x452   :  { %s869_s16 = scalar_lea.hbm %s1061_s8, 256 }
 0x453   :  { %p870_p9 = scmp.ne.s32.totalorder %s1061_s8, %s869_s16  ;;  %p873_p10 = scmp.lt.u32.totalorder %s869_s16, %s1061_s8 }
 0x455   :  { %p875_p11 = pnand %p873_p10, %p870_p9 }
 0x457   :  { %878 = shalt.err (!%p875_p11)
}
 0x458   :  { %s896_s30 = smov 128   ;;  %s897_s22 = smov 8  }
 0x459   :  { %592 = dma.vmem_to_hbm [thread:$0]  %s587_s13, 256, %s1061_s8, [#allocation4], %s896_s30, %s896_s30, %s897_s22  }
 0x45a   :  { %885 = dma.done.wait [#allocation4], 256  }
 0x45b   :  { %886 = vsyncadd [#allocation4], 4294967040 }
 0x45c   :  { %596 = vsyncpa [#allocation3], 1 }
 0x45d   :  { %597 = vsyncpa [#allocation6], 1 }
 0x45e   :  { %598 = vsyncpa [#allocation9], 1 }
 0x45f   :  { %599 = vsyncpa [#allocation4], 1 }

</bundles_post_ra>
